<compile_context>
chip_gen: v7x
topology: tpu7x:2x2x1
jax: 0.10.0
libtpu: 0.0.40
codegen_flags: <defaults>
</compile_context>

<pallas_src>
import functools

import jax
import jax.numpy as jnp
from jax.experimental import pallas as pl
from jax.experimental.pallas import tpu as pltpu

VMEM_SPEC = pl.BlockSpec(memory_space=pltpu.MemorySpace.VMEM)


def _tpu_vmem_bytes():
    try:
        info = pltpu.get_tpu_info()
        cap = getattr(info, "vmem_capacity_bytes", None)
        if cap:
            return int(cap)
    except Exception:
        pass
    return 128 * 1024 * 1024


_VMEM_BYTES = _tpu_vmem_bytes()
# 96 MiB scoped limit on 128 MiB parts (v5e/v6e), 48 MiB on 64 MiB v7x.
VMEM_LIMIT = min(int(_VMEM_BYTES * 3 // 4), 100 * 1024 * 1024)
_BIG_VMEM = _VMEM_BYTES >= 100 * 1024 * 1024
TM_MAX = 512 if _BIG_VMEM else 256     # sublane-axis tile cap
TN_MAX = 1024 if _BIG_VMEM else 512    # lane-axis tile cap
TK_MAX = 512                           # contraction tile cap


def _pick_tile(dim, max_tile, align):
    """Largest divisor of dim that is a multiple of `align` and <= max_tile.

    Falls back to the full dim (a block equal to the full array dim is always
    legal) so we never emit sublane/lane-unaligned partial tiles.
    """
    if dim <= max_tile:
        return dim
    t = (max_tile // align) * align
    while t >= align:
        if dim % t == 0:
            return t
        t -= align
    return dim


# --------------------------------------------------------------------------
# tiled linear (+ optional activation)
# --------------------------------------------------------------------------
def _linear_kernel(x_ref, w_ref, b_ref, o_ref, acc_ref, *, act):
    k = pl.program_id(2)

    @pl.when(k == 0)
    def _():
        acc_ref[...] = jnp.zeros_like(acc_ref)

    acc_ref[...] += jnp.dot(x_ref[...], w_ref[...],
                            preferred_element_type=jnp.float32)

    @pl.when(k == pl.num_programs(2) - 1)
    def _():
        y = acc_ref[...] + b_ref[...]
        if act == "relu":
            y = jnp.maximum(y, 0.0)
        elif act == "gelu":
            y = jax.nn.gelu(y)  # tanh approximation (see TODO above)
        o_ref[...] = y.astype(o_ref.dtype)


def linear(x, w, b2d, act="none", out_dtype=jnp.bfloat16,
           tm_max=TM_MAX, tn_max=TN_MAX, tk_max=TK_MAX):
    m, kdim = x.shape
    n = w.shape[1]
    tm = _pick_tile(m, tm_max, 8)
    tn = _pick_tile(n, tn_max, 128)
    tk = _pick_tile(kdim, tk_max, 128)
    grid = (m // tm, n // tn, kdim // tk)
    return pl.pallas_call(
        functools.partial(_linear_kernel, act=act),
        out_shape=jax.ShapeDtypeStruct((m, n), out_dtype),
        grid_spec=pltpu.PrefetchScalarGridSpec(
            num_scalar_prefetch=0,
            grid=grid,
            in_specs=[
                pl.BlockSpec((tm, tk), lambda i, j, kk: (i, kk)),
                pl.BlockSpec((tk, tn), lambda i, j, kk: (kk, j)),
                pl.BlockSpec((1, tn), lambda i, j, kk: (0, j)),
            ],
            out_specs=pl.BlockSpec((tm, tn), lambda i, j, kk: (i, j)),
            scratch_shapes=[pltpu.VMEM((tm, tn), jnp.float32)],
        ),
        compiler_params=pltpu.CompilerParams(
            dimension_semantics=("parallel", "parallel", "arbitrary"),
            vmem_limit_bytes=VMEM_LIMIT,
        ),
    )(x, w, b2d)


# --------------------------------------------------------------------------
# tiled linear + residual + LayerNorm epilogue   (attention output proj)
# --------------------------------------------------------------------------
def _linear_res_ln_kernel(x_ref, w_ref, b_ref, res_ref, g_ref, beta_ref,
                          o_ref, acc_ref, *, eps):
    k = pl.program_id(1)

    @pl.when(k == 0)
    def _():
        acc_ref[...] = jnp.zeros_like(acc_ref)

    acc_ref[...] += jnp.dot(x_ref[...], w_ref[...],
                            preferred_element_type=jnp.float32)

    @pl.when(k == pl.num_programs(1) - 1)
    def _():
        y = acc_ref[...] + b_ref[...] + res_ref[...].astype(jnp.float32)
        mu = jnp.mean(y, axis=-1, keepdims=True)
        var = jnp.mean((y - mu) * (y - mu), axis=-1, keepdims=True)
        o_ref[...] = ((y - mu) * jax.lax.rsqrt(var + eps) * g_ref[...]
                      + beta_ref[...]).astype(o_ref.dtype)


def linear_res_ln(x, w, b2d, residual, gamma2d, beta2d, eps=1e-12,
                  out_dtype=jnp.bfloat16, tm_max=TM_MAX, tk_max=TK_MAX):
    m, kdim = x.shape
    n = w.shape[1]  # LayerNorm needs the full row -> N untiled
    tm = _pick_tile(m, tm_max, 8)
    tk = _pick_tile(kdim, tk_max, 128)
    grid = (m // tm, kdim // tk)
    return pl.pallas_call(
        functools.partial(_linear_res_ln_kernel, eps=eps),
        out_shape=jax.ShapeDtypeStruct((m, n), out_dtype),
        grid_spec=pltpu.PrefetchScalarGridSpec(
            num_scalar_prefetch=0,
            grid=grid,
            in_specs=[
                pl.BlockSpec((tm, tk), lambda i, kk: (i, kk)),
                pl.BlockSpec((tk, n), lambda i, kk: (kk, 0)),
                pl.BlockSpec((1, n), lambda i, kk: (0, 0)),
                pl.BlockSpec((tm, n), lambda i, kk: (i, 0)),
                pl.BlockSpec((1, n), lambda i, kk: (0, 0)),
                pl.BlockSpec((1, n), lambda i, kk: (0, 0)),
            ],
            out_specs=pl.BlockSpec((tm, n), lambda i, kk: (i, 0)),
            scratch_shapes=[pltpu.VMEM((tm, n), jnp.float32)],
        ),
        compiler_params=pltpu.CompilerParams(
            dimension_semantics=("parallel", "arbitrary"),
            vmem_limit_bytes=VMEM_LIMIT,
        ),
    )(x, w, b2d, residual, gamma2d, beta2d)


# --------------------------------------------------------------------------
# fused FFN: w1 + GELU + w2 + residual + LayerNorm  (no [M,FFN] HBM round trip)
# --------------------------------------------------------------------------
def _ffn_res_ln_kernel(x_ref, w1_ref, b1_ref, w2_ref, b2_ref, res_ref,
                       g_ref, beta_ref, o_ref, acc_ref, *, eps):
    f = pl.program_id(1)

    @pl.when(f == 0)
    def _():
        acc_ref[...] = jnp.zeros_like(acc_ref)

    # h_f = gelu(x @ w1[:, f] + b1[f])  -- stays in VMEM/vregs only
    h = jnp.dot(x_ref[...], w1_ref[...], preferred_element_type=jnp.float32)
    h = jax.nn.gelu(h + b1_ref[...])
    acc_ref[...] += jnp.dot(h.astype(w2_ref.dtype), w2_ref[...],
                            preferred_element_type=jnp.float32)

    @pl.when(f == pl.num_programs(1) - 1)
    def _():
        y = acc_ref[...] + b2_ref[...] + res_ref[...].astype(jnp.float32)
        mu = jnp.mean(y, axis=-1, keepdims=True)
        var = jnp.mean((y - mu) * (y - mu), axis=-1, keepdims=True)
        o_ref[...] = ((y - mu) * jax.lax.rsqrt(var + eps) * g_ref[...]
                      + beta_ref[...]).astype(o_ref.dtype)


def ffn_res_ln(x, w1, b1_2d, w2, b2_2d, residual, gamma2d, beta2d, eps=1e-12,
               out_dtype=jnp.bfloat16, tm_max=TM_MAX, tf_max=512):
    m, h = x.shape
    ffn = w1.shape[1]
    tm = _pick_tile(m, tm_max, 8)
    tf = _pick_tile(ffn, tf_max, 128)
    grid = (m // tm, ffn // tf)
    return pl.pallas_call(
        functools.partial(_ffn_res_ln_kernel, eps=eps),
        out_shape=jax.ShapeDtypeStruct((m, h), out_dtype),
        grid_spec=pltpu.PrefetchScalarGridSpec(
            num_scalar_prefetch=0,
            grid=grid,
            in_specs=[
                pl.BlockSpec((tm, h), lambda i, f: (i, 0)),   # x
                pl.BlockSpec((h, tf), lambda i, f: (0, f)),   # w1
                pl.BlockSpec((1, tf), lambda i, f: (0, f)),   # b1
                pl.BlockSpec((tf, h), lambda i, f: (f, 0)),   # w2
                pl.BlockSpec((1, h), lambda i, f: (0, 0)),    # b2
                pl.BlockSpec((tm, h), lambda i, f: (i, 0)),   # residual
                pl.BlockSpec((1, h), lambda i, f: (0, 0)),    # gamma
                pl.BlockSpec((1, h), lambda i, f: (0, 0)),    # beta
            ],
            out_specs=pl.BlockSpec((tm, h), lambda i, f: (i, 0)),
            scratch_shapes=[pltpu.VMEM((tm, h), jnp.float32)],
        ),
        compiler_params=pltpu.CompilerParams(
            dimension_semantics=("parallel", "arbitrary"),
            vmem_limit_bytes=VMEM_LIMIT,
        ),
    )(x, w1, b1_2d, w2, b2_2d, residual, gamma2d, beta2d)


# --------------------------------------------------------------------------
# standalone LayerNorm (embeddings only)
# --------------------------------------------------------------------------
def _ln_kernel(x_ref, g_ref, b_ref, o_ref, *, eps):
    x = x_ref[...].astype(jnp.float32)
    mu = jnp.mean(x, axis=-1, keepdims=True)
    var = jnp.mean((x - mu) * (x - mu), axis=-1, keepdims=True)
    o_ref[...] = ((x - mu) * jax.lax.rsqrt(var + eps) * g_ref[...]
                  + b_ref[...]).astype(o_ref.dtype)


def layernorm(x, gamma2d, beta2d, eps=1e-12, out_dtype=jnp.bfloat16,
              tm_max=TM_MAX):
    m, h = x.shape
    tm = _pick_tile(m, tm_max, 8)
    return pl.pallas_call(
        functools.partial(_ln_kernel, eps=eps),
        out_shape=jax.ShapeDtypeStruct((m, h), out_dtype),
        grid_spec=pltpu.PrefetchScalarGridSpec(
            num_scalar_prefetch=0,
            grid=(m // tm,),
            in_specs=[
                pl.BlockSpec((tm, h), lambda i: (i, 0)),
                pl.BlockSpec((1, h), lambda i: (0, 0)),
                pl.BlockSpec((1, h), lambda i: (0, 0)),
            ],
            out_specs=pl.BlockSpec((tm, h), lambda i: (i, 0)),
        ),
        compiler_params=pltpu.CompilerParams(
            dimension_semantics=("parallel",),
            vmem_limit_bytes=VMEM_LIMIT,
        ),
    )(x, gamma2d, beta2d)


# --------------------------------------------------------------------------
# attention: grid over (batch, head), head-major lane-dense [B, nH, S, dh]
# softmax scale is pre-folded into the Q projection weights.
# --------------------------------------------------------------------------
def _attention_kernel(q_ref, k_ref, v_ref, mask_ref, o_ref):
    q = q_ref[...]                                  # [S, dh] bf16 (pre-scaled)
    k = k_ref[...]                                  # [S, dh]
    v = v_ref[...]                                  # [S, dh]
    neg = (1.0 - mask_ref[...]) * -1e9              # [1, S] additive mask, f32
    s = jax.lax.dot_general(q, k, (((1,), (1,)), ((), ())),
                            preferred_element_type=jnp.float32)   # [S, S]
    s = s + neg
    mx = jnp.max(s, axis=-1, keepdims=True)
    p = jnp.exp(s - mx)
    p = p * pl.reciprocal(jnp.sum(p, axis=-1, keepdims=True), approx=True)
    o_ref[...] = jnp.dot(p.astype(v.dtype), v,
                         preferred_element_type=jnp.float32).astype(o_ref.dtype)


def attention(q, k, v, mask_b1s):
    b, nh, s, dh = q.shape
    qkv_spec = pl.BlockSpec((None, None, s, dh), lambda i, j: (i, j, 0, 0))
    return pl.pallas_call(
        _attention_kernel,
        out_shape=jax.ShapeDtypeStruct((b, nh, s, dh), jnp.bfloat16),
        grid_spec=pltpu.PrefetchScalarGridSpec(
            num_scalar_prefetch=0,
            grid=(b, nh),
            in_specs=[
                qkv_spec, qkv_spec, qkv_spec,
                pl.BlockSpec((None, 1, s), lambda i, j: (i, 0, 0)),
            ],
            out_specs=pl.BlockSpec((None, None, s, dh),
                                   lambda i, j: (i, j, 0, 0)),
        ),
        compiler_params=pltpu.CompilerParams(
            dimension_semantics=("parallel", "parallel"),
            vmem_limit_bytes=VMEM_LIMIT,
        ),
    )(q, k, v, mask_b1s)


# --------------------------------------------------------------------------
# pooler / label / normalize heads
# --------------------------------------------------------------------------
def _head_kernel(cls_ref, wp_ref, bp_ref, wl_ref, bl_ref, logits_ref, norm_ref):
    x32 = cls_ref[...].astype(jnp.float32)
    # get_emedding: pooler_fc -> dropout(identity) -> relu
    h = jnp.dot(cls_ref[...], wp_ref[...],
                preferred_element_type=jnp.float32) + bp_ref[...]
    h = jnp.maximum(h, 0.0)
    # label linear -> dropout(identity)   (output padded to lane-dense width)
    logits_ref[...] = jnp.dot(h.astype(wl_ref.dtype), wl_ref[...],
                              preferred_element_type=jnp.float32) + bl_ref[...]
    # F.normalize(cls, dim=1): x / max(||x||_2, 1e-12)
    denom = jnp.maximum(jnp.sqrt(jnp.sum(x32 * x32, axis=-1, keepdims=True)),
                        1e-12)
    norm_ref[...] = x32 / denom


def heads(cls_tok, wp, bp_2d, wl_pad, bl_2d, n_labels):
    b, h = cls_tok.shape
    npad = wl_pad.shape[1]
    logits_pad, cls_norm = pl.pallas_call(
        _head_kernel,
        out_shape=(
            jax.ShapeDtypeStruct((b, npad), jnp.float32),
            jax.ShapeDtypeStruct((b, h), jnp.float32),
        ),
        in_specs=[VMEM_SPEC] * 5,
        out_specs=(VMEM_SPEC, VMEM_SPEC),
        compiler_params=pltpu.CompilerParams(vmem_limit_bytes=VMEM_LIMIT),
    )(cls_tok, wp, bp_2d, wl_pad, bl_2d)
    return logits_pad[:, :n_labels], cls_norm


# --------------------------------------------------------------------------
# parameters (synthetic, pre-shaped biases, scale folded into Q projection)
# --------------------------------------------------------------------------
def make_params(key, *, vocab, max_pos, hidden, n_heads, ffn, n_layers,
                n_labels):
    ks = iter(jax.random.split(key, 16 + n_layers * 16))
    nrm = lambda shape: 0.02 * jax.random.normal(next(ks), shape, jnp.float32)
    npad = ((n_labels + 127) // 128) * 128
    dh = hidden // n_heads
    scale = 1.0 / (dh ** 0.5)

    wl = nrm((hidden, n_labels))
    bl = nrm((n_labels,))
    p = {
        "tok_emb": nrm((vocab, hidden)),
        "pos_emb": nrm((max_pos, hidden)),
        "emb_ln_g": jnp.ones((1, hidden), jnp.float32),
        "emb_ln_b": jnp.zeros((1, hidden), jnp.float32),
        "layers": [],
        "pooler_w": nrm((hidden, hidden)).astype(jnp.bfloat16),
        "pooler_b": nrm((hidden,)).reshape(1, hidden),
        "label_w": jnp.zeros((hidden, npad), jnp.float32).at[:, :n_labels]
                     .set(wl).astype(jnp.bfloat16),
        "label_b": jnp.zeros((npad,), jnp.float32).at[:n_labels]
                     .set(bl).reshape(1, npad),
        "n_labels": n_labels,
    }
    for _ in range(n_layers):
        # fused QKV projection, softmax scale folded into the Q columns
        wq, wk, wv = nrm((hidden, hidden)), nrm((hidden, hidden)), nrm((hidden, hidden))
        bq, bk, bv = nrm((hidden,)), nrm((hidden,)), nrm((hidden,))
        layer = {
            "w_qkv": jnp.concatenate([wq * scale, wk, wv], axis=1)
                        .astype(jnp.bfloat16),
            "b_qkv": jnp.concatenate([bq * scale, bk, bv]).reshape(1, 3 * hidden),
            "wo": nrm((hidden, hidden)).astype(jnp.bfloat16),
            "bo": nrm((hidden,)).reshape(1, hidden),
            "ln1_g": jnp.ones((1, hidden), jnp.float32),
            "ln1_b": jnp.zeros((1, hidden), jnp.float32),
            "w1": nrm((hidden, ffn)).astype(jnp.bfloat16),
            "b1": nrm((ffn,)).reshape(1, ffn),
            "w2": nrm((ffn, hidden)).astype(jnp.bfloat16),
            "b2": nrm((hidden,)).reshape(1, hidden),
            "ln2_g": jnp.ones((1, hidden), jnp.float32),
            "ln2_b": jnp.zeros((1, hidden), jnp.float32),
        }
        p["layers"].append(layer)
    return p


# --------------------------------------------------------------------------
# model
# --------------------------------------------------------------------------
def encoder_forward(params, text, attn_mask, *, n_heads):
    b, s = text.shape
    hidden = params["tok_emb"].shape[1]
    dh = hidden // n_heads
    m = b * s

    # embeddings (gather is JAX glue, not the hot path) -> LN
    x = jnp.take(params["tok_emb"], text, axis=0) + params["pos_emb"][None, :s, :]
    xf = layernorm(x.reshape(m, hidden), params["emb_ln_g"], params["emb_ln_b"])

    # raw [B,1,S] mask row; broadcast to -1e9 additive form inside the kernel
    mask_b1s = attn_mask.astype(jnp.float32).reshape(b, 1, s)

    for lyr in params["layers"]:
        qkv = linear(xf, lyr["w_qkv"], lyr["b_qkv"])                 # [M, 3H]
        # head-major, lane-dense layout (cheap XLA transpose outside kernels)
        qkv_h = qkv.reshape(b, s, 3, n_heads, dh).transpose(2, 0, 3, 1, 4)
        ctx = attention(qkv_h[0], qkv_h[1], qkv_h[2], mask_b1s)     # [B,nH,S,dh]
        ctx = ctx.transpose(0, 2, 1, 3).reshape(m, hidden)
        # wo projection fused with (+ residual, LayerNorm1)
        xf = linear_res_ln(ctx, lyr["wo"], lyr["bo"],
                           xf, lyr["ln1_g"], lyr["ln1_b"])
        # fused FFN: w1 + GELU + w2 (+ residual, LayerNorm2), no HBM round trip
        xf = ffn_res_ln(xf, lyr["w1"], lyr["b1"], lyr["w2"], lyr["b2"],
                        xf, lyr["ln2_g"], lyr["ln2_b"])

    return xf.reshape(b, s, hidden)  # hidden_states[-1]


def contextual_encoder_forward(params, text, attn_mask, *, n_heads):
    last_hidden = encoder_forward(params, text, attn_mask, n_heads=n_heads)
    cls_tok = last_hidden[:, 0, :]
    logits, cls_norm = heads(
        cls_tok, params["pooler_w"], params["pooler_b"],
        params["label_w"], params["label_b"], params["n_labels"],
    )
    return logits, cls_norm


# --------------------------------------------------------------------------
if __name__ == "__main__":
    B, S, H, N_HEADS, FFN, N_LAYERS = 2, 8, 32, 4, 64, 2
    VOCAB, MAX_POS, N_LABELS = 50, 16, 3

    key = jax.random.PRNGKey(0)
    k_param, k_text = jax.random.split(key)

    params = make_params(
        k_param, vocab=VOCAB, max_pos=MAX_POS, hidden=H,
        n_heads=N_HEADS, ffn=FFN, n_layers=N_LAYERS, n_labels=N_LABELS,
    )

    text = jax.random.randint(k_text, (B, S), 0, VOCAB, dtype=jnp.int32)
    attn_mask = jnp.ones((B, S), jnp.int32).at[1, 6:].set(0)  # 2nd example padded

    logits, cls_norm = contextual_encoder_forward(params, text, attn_mask,
                                                  n_heads=N_HEADS)
    jax.block_until_ready((logits, cls_norm))

    assert logits.shape == (B, N_LABELS) and cls_norm.shape == (B, H)
    assert bool(jnp.all(jnp.isfinite(logits))) and bool(jnp.all(jnp.isfinite(cls_norm)))
    print("KERNEL_OK")
</pallas_src>

<mosaic_0001>
module attributes {stable_mosaic.version = 11 : i64} {
  func.func @_ln_kernel(%arg0: i32, %arg1: memref<16x32xf32, #tpu.memory_space<vmem>>, %arg2: memref<1x32xf32, #tpu.memory_space<vmem>>, %arg3: memref<1x32xf32, #tpu.memory_space<vmem>>, %arg4: memref<16x32xbf16, #tpu.memory_space<vmem>>) attributes {dimension_semantics = [#tpu.dimension_semantics<parallel>], iteration_bounds = array<i64: 1>, scalar_prefetch = 0 : i64, scratch_operands = 0 : i64, tpu.core_type = #tpu.core_type<tc>, window_params = [{transform_indices = @transform_0, window_bounds = array<i64: 16, 32>}, {pipeline_mode = #tpu.pipeline_mode<synchronous>, transform_indices = @transform_1, window_bounds = array<i64: 1, 32>}, {pipeline_mode = #tpu.pipeline_mode<synchronous>, transform_indices = @transform_2, window_bounds = array<i64: 1, 32>}, {transform_indices = @transform_3, window_bounds = array<i64: 16, 32>}]} {
    %c0 = arith.constant 0 : index
    %c0_0 = arith.constant 0 : index
    %0 = vector.load %arg1[%c0, %c0_0] : memref<16x32xf32, #tpu.memory_space<vmem>>, vector<16x32xf32>
    %cst = arith.constant dense<0.000000e+00> : vector<16xf32>
    %1 = vector.multi_reduction <add>, %0, %cst [1] : vector<16x32xf32> to vector<16xf32>
    %2 = vector.shape_cast %1 : vector<16xf32> to vector<16x1xf32>
    %cst_1 = arith.constant 3.200000e+01 : f32
    %3 = vector.broadcast %cst_1 : f32 to vector<16x1xf32>
    %4 = arith.divf %2, %3 : vector<16x1xf32>
    %5 = vector.broadcast %4 : vector<16x1xf32> to vector<16x32xf32>
    %6 = arith.subf %0, %5 : vector<16x32xf32>
    %7 = vector.broadcast %4 : vector<16x1xf32> to vector<16x32xf32>
    %8 = arith.subf %0, %7 : vector<16x32xf32>
    %9 = arith.mulf %6, %8 : vector<16x32xf32>
    %cst_2 = arith.constant dense<0.000000e+00> : vector<16xf32>
    %10 = vector.multi_reduction <add>, %9, %cst_2 [1] : vector<16x32xf32> to vector<16xf32>
    %11 = vector.shape_cast %10 : vector<16xf32> to vector<16x1xf32>
    %cst_3 = arith.constant 3.200000e+01 : f32
    %12 = vector.broadcast %cst_3 : f32 to vector<16x1xf32>
    %13 = arith.divf %11, %12 : vector<16x1xf32>
    %14 = vector.broadcast %4 : vector<16x1xf32> to vector<16x32xf32>
    %15 = arith.subf %0, %14 : vector<16x32xf32>
    %cst_4 = arith.constant 9.99999996E-13 : f32
    %16 = vector.broadcast %cst_4 : f32 to vector<16x1xf32>
    %17 = arith.addf %13, %16 : vector<16x1xf32>
    %18 = math.rsqrt %17 : vector<16x1xf32>
    %19 = vector.broadcast %18 : vector<16x1xf32> to vector<16x32xf32>
    %20 = arith.mulf %15, %19 : vector<16x32xf32>
    %c0_5 = arith.constant 0 : index
    %c0_6 = arith.constant 0 : index
    %21 = vector.load %arg2[%c0_5, %c0_6] : memref<1x32xf32, #tpu.memory_space<vmem>>, vector<1x32xf32>
    %22 = vector.broadcast %21 : vector<1x32xf32> to vector<16x32xf32>
    %23 = arith.mulf %20, %22 : vector<16x32xf32>
    %c0_7 = arith.constant 0 : index
    %c0_8 = arith.constant 0 : index
    %24 = vector.load %arg3[%c0_7, %c0_8] : memref<1x32xf32, #tpu.memory_space<vmem>>, vector<1x32xf32>
    %25 = vector.broadcast %24 : vector<1x32xf32> to vector<16x32xf32>
    %26 = arith.addf %23, %25 : vector<16x32xf32>
    %27 = arith.truncf %26 : vector<16x32xf32> to vector<16x32xbf16>
    %c0_9 = arith.constant 0 : index
    %c0_10 = arith.constant 0 : index
    %28 = vector.load %arg4[%c0_9, %c0_10] : memref<16x32xbf16, #tpu.memory_space<vmem>>, vector<16x32xbf16>
    tpu.vector_store %arg4[%c0_9, %c0_10], %27 {strides = array<i32>} : memref<16x32xbf16, #tpu.memory_space<vmem>>, vector<16x32xbf16>,
    return
  }
  func.func @transform_0(%arg0: i32) -> (i32, i32) {
    %c0_i32 = arith.constant 0 : i32
    %c0_i32_0 = arith.constant 0 : i32
    return %arg0, %c0_i32 : i32, i32
  }
  func.func @transform_1(%arg0: i32) -> (i32, i32) {
    %c0_i32 = arith.constant 0 : i32
    %c0_i32_0 = arith.constant 0 : i32
    %c0_i32_1 = arith.constant 0 : i32
    return %c0_i32, %c0_i32_0 : i32, i32
  }
  func.func @transform_2(%arg0: i32) -> (i32, i32) {
    %c0_i32 = arith.constant 0 : i32
    %c0_i32_0 = arith.constant 0 : i32
    %c0_i32_1 = arith.constant 0 : i32
    return %c0_i32, %c0_i32_0 : i32, i32
  }
  func.func @transform_3(%arg0: i32) -> (i32, i32) {
    %c0_i32 = arith.constant 0 : i32
    %c0_i32_0 = arith.constant 0 : i32
    return %arg0, %c0_i32 : i32, i32
  }
}

</mosaic_0001>

<bundles_post_ra>
// kernel: tpu_custom_call.1
= control target key start
LH: loop header
LB: loop body
LE: loop exit
PB: predicated region body
PF: predicated region fallthrough
CT: control target
= control target key end

     0   :  { %8 = vsyncpa [#allocation3], 0  ;;  %s328_s0 = inlined_call_operand.hbm [shape: f32[16,32], index: 0, kind: input, shape index: {}]   ;;  %s329_s1 = inlined_call_operand.hbm [shape: f32[1,32], index: 1, kind: input, shape index: {}]   ;;  %s330_s2 = inlined_call_operand.hbm [shape: f32[1,32], index: 2, kind: input, shape index: {}]   ;;  %s331_s3 = inlined_call_operand.hbm [shape: bf16[16,32], index: 3, kind: output, shape index: {}]  }
   0x1   :  { %9 = vsyncpa [#allocation6], 0 }
   0x2   :  { %10 = vsyncpa [#allocation4], 0  ;;  %s241_s12 = smov [#allocation5]   ;;  %s242_s14 = smov [#allocation2]  }
   0x3   :  { %s29_s13 = sshll.u32 %s241_s12, 4  ;;  %s16_s15 = sshll.u32 %s242_s14, 4  ;;  %s30_s13 = int_to_ptr.vmem [resolvable:$true] %s29_s13  ;;  %s269_s15 = int_to_ptr.vmem [resolvable:$true] %s16_s15 }
   0x4   :  { %s147_s18 = scalar_lea.hbm %s329_s1, 16 }
   0x5   :  { %p148_p0 = scmp.ne.s32.totalorder %s329_s1, %s147_s18  ;;  %p151_p1 = scmp.lt.u32.totalorder %s147_s18, %s329_s1 }
   0x7   :  { %p153_p2 = pnand %p151_p1, %p148_p0 }
   0x9   :  { %156 = shalt.err (!%p153_p2)
}
   0xa   :  { %s157_s23 = scalar_lea.vmem %s30_s13, 16  ;;  %s161_s24 = scalar_lea.vmem %s30_s13, 32 }
   0xb   :  { %p158_p3 = scmp.ne.s32.totalorder %s30_s13, %s157_s23  ;;  %p162_p4 = scmp.lt.s32.totalorder %s30_s13, %s30_s13 }
   0xc   :  { %p163_p5 = scmp.lt.s32.totalorder %s161_s24, %s157_s23 }
   0xe   :  { %p164_p6 = por %p163_p5, %p162_p4 }
  0x10   :  { %p165_p7 = pnand %p164_p6, %p158_p3 }
  0x12   :  { %168 = shalt.err (!%p165_p7)
}
  0x13   :  { %32 = dma.hbm_to_vmem [thread:$0]  %s329_s1, 16, %s30_s13, [#allocation6]  }
  0x14   :  { %s169_s29 = scalar_lea.hbm %s328_s0, 256 }
  0x15   :  { %p170_p8 = scmp.ne.s32.totalorder %s328_s0, %s169_s29  ;;  %p173_p9 = scmp.lt.u32.totalorder %s169_s29, %s328_s0 }
  0x17   :  { %p175_p10 = pnand %p173_p9, %p170_p8 }
  0x19   :  { %178 = shalt.err (!%p175_p10)
}
  0x1a   :  { %s179_s7 = scalar_lea.vmem %s269_s15, 256  ;;  %p184_p12 = scmp.lt.s32.totalorder %s269_s15, %s269_s15 }
  0x1b   :  { %p180_p11 = scmp.ne.s32.totalorder %s269_s15, %s179_s7  ;;  %p185_p13 = scmp.lt.s32.totalorder %s179_s7, %s179_s7 }
  0x1d   :  { %p186_p0 = por %p185_p13, %p184_p12 }
  0x1f   :  { %p187_p1 = pnand %p186_p0, %p180_p11 }
  0x21   :  { %190 = shalt.err (!%p187_p1)
}
  0x22   :  { %s243_s1 = smov 128   ;;  %s244_s8 = smov 8  }
  0x23   :  { %22 = dma.hbm_to_vmem [thread:$0]  %s328_s0, 256, %s269_s15, [#allocation3], %s243_s1, %s243_s1, %s244_s8  }
  0x24   :  { %s245_s11 = smov [#allocation7]   ;;  %s191_s16 = scalar_lea.hbm %s330_s2, 16 }
  0x25   :  { %s39_s12 = sshll.u32 %s245_s11, 4  ;;  %p192_p2 = scmp.ne.s32.totalorder %s330_s2, %s191_s16  ;;  %s40_s12 = int_to_ptr.vmem [resolvable:$true] %s39_s12 }
  0x26   :  { %p195_p3 = scmp.lt.u32.totalorder %s191_s16, %s330_s2 }
  0x28   :  { %p197_p4 = pnand %p195_p3, %p192_p2 }
  0x2a   :  { %200 = shalt.err (!%p197_p4)
}
  0x2b   :  { %s201_s21 = scalar_lea.vmem %s40_s12, 16  ;;  %s205_s0 = scalar_lea.vmem %s40_s12, 32 }
  0x2c   :  { %p202_p5 = scmp.ne.s32.totalorder %s40_s12, %s201_s21  ;;  %p206_p6 = scmp.lt.s32.totalorder %s40_s12, %s40_s12 }
  0x2d   :  { %p207_p7 = scmp.lt.s32.totalorder %s205_s0, %s201_s21 }
  0x2f   :  { %p208_p8 = por %p207_p7, %p206_p6 }
  0x31   :  { %p209_p9 = pnand %p208_p8, %p202_p5 }
  0x33   :  { %212 = shalt.err (!%p209_p9)
}
  0x34   :  { %42 = dma.hbm_to_vmem [thread:$0]  %s330_s2, 16, %s40_s12, [#allocation6]  }
  0x35   :  { %235 = dma.done.wait [#allocation3], 256  }
  0x36   :  { %236 = vsyncadd [#allocation3], 4294967040 }
  0x37   :  { %237 = dma.done.wait [#allocation6], 32  }
  0x38   :  { %238 = vsyncadd [#allocation6], 4294967264  ;;  %vm54_vm0 = vcmask 261120   ;;  %v52_v0 = vld [vmem:[#allocation2] sm:$0xff]  ;;  %v53_v1 = vld [vmem:[#allocation2 + $0x8] sm:$0xff]  ;;  %vm108_vm1 = vcmask 257024  }
  0x39   :  { %v55_v2 = vsel %vm54_vm0, %v52_v0, 0.0  ;;  %v58_v3 = vsel %vm54_vm0, %v53_v1, 0.0  ;;  %v129_v21 = vld [vmem:[#allocation5] ss:$0 sm:$0xff]  ;;  %v130_v23 = vld [vmem:[#allocation7] ss:$0 sm:$0xff] }
  0x3a   :  { %56 = vadd.xlane.f32.xlu0 %v55_v2  ;;  %s246_s2 = smov [#allocation8]  }
  0x3b   :  { %s116_s23 = sshll.u32 %s246_s2, 4  ;;  %s117_s23 = int_to_ptr.vmem [resolvable:$true] %s116_s23 }
  0x3c   :  { %s213_s24 = scalar_lea.vmem %s117_s23, 128  ;;  %p218_p11 = scmp.lt.s32.totalorder %s117_s23, %s117_s23 }
  0x3d   :  { %p214_p10 = scmp.ne.s32.totalorder %s117_s23, %s213_s24  ;;  %p219_p12 = scmp.lt.s32.totalorder %s213_s24, %s213_s24 }
  0x3e   :  { %59 = vadd.xlane.f32.xlu0 %v58_v3 }
  0x3f   :  { %p220_p13 = por %p219_p12, %p218_p11 }
  0x41   :  { %p221_p0 = pnand %p220_p13, %p214_p10 }
  0xc7   :  { %v57_v4 = vpop.xlane.xlu0 %56 }
  0xc8   :  { %v62_v5 = vmul.f32 0.03125, %v57_v4 }
  0xca   :  { %v64_v6 = vsub.f32 %v52_v0, %v62_v5 }
  0xcb   :  { %v60_v7 = vpop.xlane.xlu0 %59 }
  0xcc   :  { %v63_v8 = vmul.f32 0.03125, %v60_v7  ;;  %v66_v9 = vmul.f32 %v64_v6, %v64_v6 }
  0xce   :  { %v65_v10 = vsub.f32 %v53_v1, %v63_v8  ;;  %v68_v11 = vsel %vm54_vm0, %v66_v9, 0.0 }
  0xcf   :  { %69 = vadd.xlane.f32.xlu1 %v68_v11 }
  0xd0   :  { %v67_v12 = vmul.f32 %v65_v10, %v65_v10 }
  0xd2   :  { %v71_v13 = vsel %vm54_vm0, %v67_v12, 0.0 }
  0xd3   :  { %72 = vadd.xlane.f32.xlu1 %v71_v13 }
 0x15c   :  { %v70_v14 = vpop.xlane.xlu1 %69 }
 0x15d   :  { %v74_v15 = vmul.f32 0.03125, %v70_v14 }
 0x15f   :  { %v76_v16 = vadd.f32 1e-12, %v74_v15 }
 0x160   :  { %v73_v17 = vpop.xlane.xlu1 %72 }
 0x161   :  { %143 = vrsqrt.f32 %v76_v16  ;;  %v75_v18 = vmul.f32 0.03125, %v73_v17 }
 0x163   :  { %v77_v19 = vadd.f32 1e-12, %v75_v18 }
 0x165   :  { %145 = vrsqrt.f32 %v77_v19 }
 0x16b   :  { %v144_v20 = vpop.eup %143 }
 0x16c   :  { %v80_v22 = vmul.f32 %v144_v20, %v64_v6 }
 0x16e   :  { %v89_v24 = vmul.f32 %v129_v21, %v80_v22 }
 0x16f   :  { %v146_v25 = vpop.eup %145 }
 0x170   :  { %v81_v26 = vmul.f32 %v146_v25, %v65_v10  ;;  %v98_v27 = vadd.f32 %v130_v23, %v89_v24 }
 0x172   :  { %v90_v28 = vmul.f32 %v129_v21, %v81_v26  ;;  %v133_v29 = vpack.c.bf16 %v98_v27, %v98_v27 }
 0x174   :  { %v99_v30 = vadd.f32 %v130_v23, %v90_v28  ;;  %109 = vst.msk [vmem:[#allocation8] sm:$0xf] %vm108_vm1, %v133_v29 }
 0x176   :  { %v134_v31 = vpack.c.bf16 %v99_v30, %v99_v30 }
 0x178   :  { %110 = vst.msk [vmem:[#allocation8 + $0x4] sm:$0xf] %vm108_vm1, %v134_v31 }
 0x179   :  { %224 = shalt.err (!%p221_p0)
}
 0x17a   :  { %s225_s27 = scalar_lea.hbm %s331_s3, 128 }
 0x17b   :  { %p226_p1 = scmp.ne.s32.totalorder %s331_s3, %s225_s27  ;;  %p229_p2 = scmp.lt.u32.totalorder %s225_s27, %s331_s3 }
 0x17d   :  { %p231_p3 = pnand %p229_p2, %p226_p1 }
 0x17f   :  { %234 = shalt.err (!%p231_p3)
}
 0x180   :  { %s247_s5 = smov 64   ;;  %s248_s6 = smov 4  }
 0x181   :  { %122 = dma.vmem_to_hbm [thread:$0]  %s117_s23, 128, %s331_s3, [#allocation4], %s247_s5, %s247_s5, %s248_s6  }
 0x182   :  { %239 = dma.done.wait [#allocation4], 128  }
 0x183   :  { %240 = vsyncadd [#allocation4], 4294967168 }
 0x184   :  { %126 = vsyncpa [#allocation3], 1 }
 0x185   :  { %127 = vsyncpa [#allocation6], 1 }
 0x186   :  { %128 = vsyncpa [#allocation4], 1 }

</bundles_post_ra>
